<compile_context>
chip_gen: v7x
topology: tpu7x:2x2x1
jax: 0.10.0
libtpu: 0.0.40
codegen_flags: <defaults>
</compile_context>

<pallas_src>
import jax
import jax.numpy as jnp
from jax.experimental import pallas as pl
from jax.experimental.pallas import tpu as pltpu

OBS = 16                  # observation feature dim
HID = 32                  # hidden width per trunk
ACT = 7                   # action dim
HID2 = 2 * HID            # fused actor|critic width  = 64
LANES = 2 * HID2          # output / head lane width  = 128
R_W3 = OBS + HID2         # row where the head weight starts        = 80
R_BIAS = OBS + 2 * HID2   # row where the bias rows start           = 144
SLAB_ROWS = R_BIAS + 8    # bias rows padded to one sublane tile    = 152


def _policy_act_kernel(x_ref, w_ref, out_ref):
    x = x_ref[...]                                    # (TB, 16)

    w1 = w_ref[0:OBS, 0:HID2]                         # (16, 64)  [Wa1 | Wc1]
    w2 = w_ref[OBS:R_W3, 0:HID2]                      # (64, 64)  blkdiag(Wa2, Wc2)
    w3 = w_ref[R_W3:R_BIAS, :]                        # (64, 128) [I_64 | Wheads]
    b1 = w_ref[R_BIAS:R_BIAS + 1, 0:HID2]             # (1, 64)   [ba1 | bc1]
    b2 = w_ref[R_BIAS + 1:R_BIAS + 2, 0:HID2]         # (1, 64)   [ba2 | bc2]
    b3 = w_ref[R_BIAS + 2:R_BIAS + 3, :]              # (1, 128)  [0 | bm,bv,logp,ent]

    h1 = jnp.tanh(jnp.dot(x, w1, preferred_element_type=jnp.float32) + b1)
    h2 = jnp.tanh(jnp.dot(h1, w2, preferred_element_type=jnp.float32) + b2)
    # Identity-augmented head: lanes 0:64 = h2 (ha|hc), lanes 64:128 = heads.
    # One unmasked lane-dense (TB, 128) store straight from the MXU result.
    out_ref[...] = jnp.dot(h2, w3, preferred_element_type=jnp.float32) + b3


def _round_up(n, m):
    return (n + m - 1) // m * m


def pack_params(params):
    """Pack the 13 per-layer tensors into ONE (152, 128) parameter slab.

    rows   0:16,  lanes 0:64   : [Wa1 | Wc1]
    rows  16:80,  lanes 0:64   : blockdiag(Wa2, Wc2)
    rows  80:144, lanes 0:128  : [I_64 | Wheads], Wheads[:32,0:7]=Wm,
                                 Wheads[32:,7]=Wv, rest zero
    row  144,     lanes 0:64   : [ba1 | bc1]
    row  145,     lanes 0:64   : [ba2 | bc2]
    row  146,     lanes 64:128 : bm (7), bv, logp_const, ent_const, rest zero
    The deterministic-action log-prob and diag-Gaussian entropy are batch
    independent, so they ride in the head bias and come out of the matmul
    already broadcast over the batch (zero extra kernel work).
    """
    f32 = jnp.float32
    w1 = jnp.concatenate([params["wa1"], params["wc1"]], axis=1)      # (16, 64)
    w2 = jnp.zeros((HID2, HID2), f32)
    w2 = w2.at[:HID, :HID].set(params["wa2"]).at[HID:, HID:].set(params["wc2"])
    heads = jnp.zeros((HID2, HID2), f32)
    heads = heads.at[:HID, :ACT].set(params["wm"])
    heads = heads.at[HID:, ACT:ACT + 1].set(params["wv"])
    w3 = jnp.concatenate([jnp.eye(HID2, dtype=f32), heads], axis=1)   # (64, 128)

    log2pi = jnp.log(jnp.float32(2.0 * jnp.pi))
    sum_logstd = jnp.sum(params["logstd"])
    logp_const = -0.5 * ACT * log2pi - sum_logstd      # z = 0 (action == mean)
    ent_const = ACT * (0.5 + 0.5 * log2pi) + sum_logstd

    slab = jnp.zeros((SLAB_ROWS, LANES), f32)
    slab = slab.at[0:OBS, 0:HID2].set(w1)
    slab = slab.at[OBS:R_W3, 0:HID2].set(w2)
    slab = slab.at[R_W3:R_BIAS, :].set(w3)
    slab = slab.at[R_BIAS, 0:HID2].set(
        jnp.concatenate([params["ba1"], params["bc1"]], axis=1)[0])
    slab = slab.at[R_BIAS + 1, 0:HID2].set(
        jnp.concatenate([params["ba2"], params["bc2"]], axis=1)[0])
    slab = slab.at[R_BIAS + 2, HID2:HID2 + ACT].set(params["bm"][0])
    slab = slab.at[R_BIAS + 2, HID2 + ACT].set(params["bv"][0, 0])
    slab = slab.at[R_BIAS + 2, HID2 + ACT + 1].set(logp_const)
    slab = slab.at[R_BIAS + 2, HID2 + ACT + 2].set(ent_const)
    return slab


def policy_act(param_slab, inputs, states, masks, deterministic=True):
    """Mirrors Policy.act(...): returns
    (value, action, action_log_probs, states, hidden_actor, hidden_critic)."""
    del masks  # passed through to forward in the reference; unused by the MLP
    # TODO(synk): stochastic sampling (deterministic=False) would need
    # pltpu.prng_seed + pltpu.stateful_normal inside the kernel.
    assert deterministic, "only the deterministic action path is implemented"

    B = inputs.shape[0]
    # Large batch tiles (kernel is overhead/writeback-bound) but keep >=2 grid
    # steps once B > one tile so v7x's two TensorCores both get work.
    TB = min(2048, max(8, _round_up(pl.cdiv(B, 2), 8)))
    grid = pl.cdiv(B, TB)

    cost = pl.CostEstimate(
        flops=2 * B * (OBS * HID2 + HID2 * HID2 + HID2 * LANES),
        transcendentals=2 * B * HID2,
        bytes_accessed=B * 4 * (OBS + LANES) + SLAB_ROWS * LANES * 4,
    )

    slab_out = pl.pallas_call(
        _policy_act_kernel,
        out_shape=jax.ShapeDtypeStruct((B, LANES), jnp.float32),
        grid_spec=pltpu.PrefetchScalarGridSpec(
            num_scalar_prefetch=0,
            grid=(grid,),
            in_specs=[
                pl.BlockSpec((TB, OBS), lambda i: (i, 0)),             # batch-tiled x
                pl.BlockSpec((SLAB_ROWS, LANES), lambda i: (0, 0)),    # resident params
            ],
            out_specs=pl.BlockSpec((TB, LANES), lambda i: (i, 0)),
        ),
        compiler_params=pltpu.CompilerParams(
            dimension_semantics=("parallel",)),
        cost_estimate=cost,
    )(inputs, param_slab)

    ha = slab_out[:, 0:HID]                               # hidden_actor (last)
    hc = slab_out[:, HID:HID2]                            # hidden_critic (last)
    action = slab_out[:, HID2:HID2 + ACT]                 # action == mean
    value = slab_out[:, HID2 + ACT:HID2 + ACT + 1]        # critic_linear output
    logp = slab_out[:, HID2 + ACT + 1:HID2 + ACT + 2]     # diag-gaussian log-prob
    # lane HID2+ACT+2 holds the (discarded by act()) entropy constant.

    # hidden_* are 1-element tuples so `hidden_actor[-1]` matches the reference.
    return value, action, logp, states, (ha,), (hc,)


def init_params(key):
    ks = jax.random.split(key, 7)

    def lin(k, fin, fout):
        w = jax.random.normal(k, (fin, fout), jnp.float32) / jnp.sqrt(
            jnp.float32(fin))
        b = jnp.zeros((1, fout), jnp.float32)
        return w, b

    wa1, ba1 = lin(ks[0], OBS, HID)
    wa2, ba2 = lin(ks[1], HID, HID)
    wc1, bc1 = lin(ks[2], OBS, HID)
    wc2, bc2 = lin(ks[3], HID, HID)
    wv, bv = lin(ks[4], HID, 1)      # critic_linear
    wm, bm = lin(ks[5], HID, ACT)    # dist mean head
    logstd = jnp.zeros((1, ACT), jnp.float32)
    return dict(wa1=wa1, ba1=ba1, wa2=wa2, ba2=ba2,
                wc1=wc1, bc1=bc1, wc2=wc2, bc2=bc2,
                wv=wv, bv=bv, wm=wm, bm=bm, logstd=logstd)


def _reference_act(params, x):
    ha = jnp.tanh(jnp.tanh(x @ params["wa1"] + params["ba1"]) @ params["wa2"]
                  + params["ba2"])
    hc = jnp.tanh(jnp.tanh(x @ params["wc1"] + params["bc1"]) @ params["wc2"]
                  + params["bc2"])
    value = hc @ params["wv"] + params["bv"]
    mean = ha @ params["wm"] + params["bm"]
    logstd = params["logstd"]
    action = mean
    logp = (-0.5 * ((action - mean) / jnp.exp(logstd)) ** 2
            - 0.5 * jnp.log(2.0 * jnp.pi) - logstd)
    logp = jnp.sum(logp, axis=-1, keepdims=True)
    return value, action, logp, ha, hc


if __name__ == "__main__":
    key = jax.random.PRNGKey(0)
    kp, kx = jax.random.split(key)
    params = init_params(kp)
    param_slab = pack_params(params)

    B = 8
    inputs = jax.random.normal(kx, (B, OBS), jnp.float32)
    states = jnp.zeros((1, HID), jnp.float32)
    masks = jnp.ones((B, 1), jnp.float32)

    outs = policy_act(param_slab, inputs, states, masks, deterministic=True)
    value, action, logp, states_out, hidden_actor, hidden_critic = (
        jax.block_until_ready(outs))

    # correctness check against a pure-JAX reference on the unpacked params
    rv, ra, rl, rha, rhc = _reference_act(params, inputs)
    assert jnp.allclose(value, rv, atol=1e-5)
    assert jnp.allclose(action, ra, atol=1e-5)
    assert jnp.allclose(logp, jnp.broadcast_to(rl, logp.shape), atol=1e-5)
    assert jnp.allclose(hidden_actor[-1], rha, atol=1e-5)
    assert jnp.allclose(hidden_critic[-1], rhc, atol=1e-5)

    print("KERNEL_OK")
</pallas_src>

<mosaic_0001>
module attributes {stable_mosaic.version = 11 : i64} {
  func.func @_policy_act_kernel(%arg0: i32, %arg1: memref<8x16xf32, #tpu.memory_space<vmem>>, %arg2: memref<152x128xf32, #tpu.memory_space<vmem>>, %arg3: memref<8x128xf32, #tpu.memory_space<vmem>>) attributes {dimension_semantics = [#tpu.dimension_semantics<parallel>], iteration_bounds = array<i64: 1>, scalar_prefetch = 0 : i64, scratch_operands = 0 : i64, tpu.core_type = #tpu.core_type<tc>, window_params = [{transform_indices = @transform_0, window_bounds = array<i64: 8, 16>}, {pipeline_mode = #tpu.pipeline_mode<synchronous>, transform_indices = @transform_1, window_bounds = array<i64: 152, 128>}, {transform_indices = @transform_2, window_bounds = array<i64: 8, 128>}]} {
    %c0 = arith.constant 0 : index
    %c0_0 = arith.constant 0 : index
    %0 = vector.load %arg1[%c0, %c0_0] : memref<8x16xf32, #tpu.memory_space<vmem>>, vector<8x16xf32>
    %c0_1 = arith.constant 0 : index
    %c0_2 = arith.constant 0 : index
    %1 = vector.load %arg2[%c0_1, %c0_2] : memref<152x128xf32, #tpu.memory_space<vmem>>, vector<16x64xf32>
    %c16 = arith.constant 16 : index
    %c0_3 = arith.constant 0 : index
    %2 = vector.load %arg2[%c16, %c0_3] : memref<152x128xf32, #tpu.memory_space<vmem>>, vector<64x64xf32>
    %c80 = arith.constant 80 : index
    %c0_4 = arith.constant 0 : index
    %3 = vector.load %arg2[%c80, %c0_4] : memref<152x128xf32, #tpu.memory_space<vmem>>, vector<64x128xf32>
    %c144 = arith.constant 144 : index
    %c0_5 = arith.constant 0 : index
    %4 = vector.load %arg2[%c144, %c0_5] : memref<152x128xf32, #tpu.memory_space<vmem>>, vector<1x64xf32>
    %c145 = arith.constant 145 : index
    %c0_6 = arith.constant 0 : index
    %5 = vector.load %arg2[%c145, %c0_6] : memref<152x128xf32, #tpu.memory_space<vmem>>, vector<1x64xf32>
    %c146 = arith.constant 146 : index
    %c0_7 = arith.constant 0 : index
    %6 = vector.load %arg2[%c146, %c0_7] : memref<152x128xf32, #tpu.memory_space<vmem>>, vector<1x128xf32>
    %cst = arith.constant dense<0.000000e+00> : vector<8x64xf32>
    %7 = tpu.matmul %0, %1, %cst {dimension_numbers = #tpu.dot_dimension_numbers<[1], [0], [0], [1], [0, 0, 1, 1], [], []>} : vector<8x16xf32>, vector<16x64xf32>, vector<8x64xf32> -> vector<8x64xf32>
    %8 = vector.broadcast %4 : vector<1x64xf32> to vector<8x64xf32>
    %9 = arith.addf %7, %8 : vector<8x64xf32>
    %10 = math.tanh %9 : vector<8x64xf32>
    %cst_8 = arith.constant dense<0.000000e+00> : vector<8x64xf32>
    %11 = tpu.matmul %10, %2, %cst_8 {dimension_numbers = #tpu.dot_dimension_numbers<[1], [0], [0], [1], [0, 0, 1, 1], [], []>} : vector<8x64xf32>, vector<64x64xf32>, vector<8x64xf32> -> vector<8x64xf32>
    %12 = vector.broadcast %5 : vector<1x64xf32> to vector<8x64xf32>
    %13 = arith.addf %11, %12 : vector<8x64xf32>
    %14 = math.tanh %13 : vector<8x64xf32>
    %cst_9 = arith.constant dense<0.000000e+00> : vector<8x128xf32>
    %15 = tpu.matmul %14, %3, %cst_9 {dimension_numbers = #tpu.dot_dimension_numbers<[1], [0], [0], [1], [0, 0, 1, 1], [], []>} : vector<8x64xf32>, vector<64x128xf32>, vector<8x128xf32> -> vector<8x128xf32>
    %16 = vector.broadcast %6 : vector<1x128xf32> to vector<8x128xf32>
    %17 = arith.addf %15, %16 : vector<8x128xf32>
    %c0_10 = arith.constant 0 : index
    %c0_11 = arith.constant 0 : index
    %18 = vector.load %arg3[%c0_10, %c0_11] : memref<8x128xf32, #tpu.memory_space<vmem>>, vector<8x128xf32>
    tpu.vector_store %arg3[%c0_10, %c0_11], %17 {strides = array<i32>} : memref<8x128xf32, #tpu.memory_space<vmem>>, vector<8x128xf32>,
    return
  }
  func.func @transform_0(%arg0: i32) -> (i32, i32) {
    %c0_i32 = arith.constant 0 : i32
    %c0_i32_0 = arith.constant 0 : i32
    return %arg0, %c0_i32 : i32, i32
  }
  func.func @transform_1(%arg0: i32) -> (i32, i32) {
    %c0_i32 = arith.constant 0 : i32
    %c0_i32_0 = arith.constant 0 : i32
    %c0_i32_1 = arith.constant 0 : i32
    return %c0_i32, %c0_i32_0 : i32, i32
  }
  func.func @transform_2(%arg0: i32) -> (i32, i32) {
    %c0_i32 = arith.constant 0 : i32
    %c0_i32_0 = arith.constant 0 : i32
    return %arg0, %c0_i32 : i32, i32
  }
}

</mosaic_0001>

<bundles_post_ra>
// kernel: tpu_custom_call.1
= control target key start
LH: loop header
LB: loop body
LE: loop exit
PB: predicated region body
PF: predicated region fallthrough
CT: control target
= control target key end

     0   :  { %7 = vsyncpa [#allocation3], 0  ;;  %s566_s0 = inlined_call_operand.hbm [shape: f32[8,16], index: 0, kind: input, shape index: {}]   ;;  %s567_s1 = inlined_call_operand.hbm [shape: f32[152,128], index: 1, kind: input, shape index: {}]   ;;  %s568_s2 = inlined_call_operand.hbm [shape: f32[8,128], index: 2, kind: output, shape index: {}]  }
   0x1   :  { %8 = vsyncpa [#allocation6], 0 }
   0x2   :  { %9 = vsyncpa [#allocation4], 0  ;;  %s495_s9 = smov [#allocation2]   ;;  %s496_s11 = smov [#allocation5]  }
   0x3   :  { %s16_s10 = sshll.u32 %s495_s9, 4  ;;  %s25_s12 = sshll.u32 %s496_s11, 4  ;;  %s17_s10 = int_to_ptr.vmem [resolvable:$true] %s16_s10  ;;  %s518_s12 = int_to_ptr.vmem [resolvable:$true] %s25_s12 }
   0x4   :  { %s423_s15 = scalar_lea.hbm %s566_s0, 128 }
   0x5   :  { %p424_p0 = scmp.ne.s32.totalorder %s566_s0, %s423_s15  ;;  %p427_p1 = scmp.lt.u32.totalorder %s423_s15, %s566_s0 }
   0x7   :  { %p429_p2 = pnand %p427_p1, %p424_p0 }
   0x9   :  { %432 = shalt.err (!%p429_p2)
}
   0xa   :  { %s433_s20 = scalar_lea.vmem %s17_s10, 128  ;;  %p438_p4 = scmp.lt.s32.totalorder %s17_s10, %s17_s10 }
   0xb   :  { %p434_p3 = scmp.ne.s32.totalorder %s17_s10, %s433_s20  ;;  %p439_p5 = scmp.lt.s32.totalorder %s433_s20, %s433_s20 }
   0xd   :  { %p440_p6 = por %p439_p5, %p438_p4 }
   0xf   :  { %p441_p7 = pnand %p440_p6, %p434_p3 }
  0x11   :  { %444 = shalt.err (!%p441_p7)
}
  0x12   :  { %19 = dma.hbm_to_vmem [thread:$0]  %s566_s0, 128, %s17_s10, [#allocation3]  }
  0x13   :  { %s445_s25 = scalar_lea.hbm %s567_s1, 2432 }
  0x14   :  { %p446_p8 = scmp.ne.s32.totalorder %s567_s1, %s445_s25  ;;  %p449_p9 = scmp.lt.u32.totalorder %s445_s25, %s567_s1 }
  0x16   :  { %p451_p10 = pnand %p449_p9, %p446_p8 }
  0x18   :  { %454 = shalt.err (!%p451_p10)
}
  0x19   :  { %s455_s30 = scalar_lea.vmem %s518_s12, 2432  ;;  %p460_p12 = scmp.lt.s32.totalorder %s518_s12, %s518_s12 }
  0x1a   :  { %p456_p11 = scmp.ne.s32.totalorder %s518_s12, %s455_s30  ;;  %p461_p13 = scmp.lt.s32.totalorder %s455_s30, %s455_s30 }
  0x1c   :  { %p462_p0 = por %p461_p13, %p460_p12 }
  0x1e   :  { %p463_p1 = pnand %p462_p0, %p456_p11 }
  0x20   :  { %466 = shalt.err (!%p463_p1)
}
  0x21   :  { %s497_s0 = smov 128   ;;  %s498_s3 = smov 8  }
  0x22   :  { %31 = dma.hbm_to_vmem [thread:$0]  %s567_s1, 2432, %s518_s12, [#allocation6], %s497_s0, %s497_s0, %s498_s3  }
  0x23   :  { %489 = dma.done.wait [#allocation3], 128  }
  0x24   :  { %490 = vsyncadd [#allocation3], 4294967168 }
  0x25   :  { %491 = dma.done.wait [#allocation6], 2432  }
  0x26   :  { %492 = vsyncadd [#allocation6], 4294964864  ;;  %v499_v0 = vmov 0.0|0.0   ;;  %vm500_vm0 = vmmov 0   ;;  %v501_v1 = vmov 0.0   ;;  %v39_v2 = vld [vmem:[#allocation5] sm:$0xff] }
  0x27   :  { %384 = vmatprep.subr.bf16.mxu0 %v499_v0  ;;  %343 = vmatprep.mubr.msk.f32.mxu0 %vm500_vm0, %v501_v1  ;;  %v40_v3 = vld [vmem:[#allocation5 + $0x8] sm:$0xff]  ;;  %v41_v5 = vld [vmem:[#allocation5 + $0x10] sm:$0xff]  ;;  %v42_v6 = vld [vmem:[#allocation5 + $0x18] sm:$0xff]  ;;  %vm64_vm1 = vcmask 130048   ;;  %vm143_vm2 = vcmask 523264   ;;  %s502_s1 = smov [#allocation7]  }
  0x28   :  { %387 = vmatprep.subr.bf16.mxu1 %v499_v0  ;;  %362 = vmatprep.mubr.msk.f32.mxu1 %vm500_vm0, %v501_v1  ;;  %v385_v4 = vpack.c.bf16 %v40_v3, %v39_v2  ;;  %v388_v7 = vpack.c.bf16 %v42_v6, %v41_v5  ;;  %v38_v8 = vld [vmem:[#allocation2] sm:$0xff]  ;;  %v43_v9 = vld [vmem:[#allocation5 + $0x20] sm:$0xff]  ;;  %v44_v10 = vld [vmem:[#allocation5 + $0x28] sm:$0xff]  ;;  %s302_s6 = sshll.u32 %s502_s1, 4  ;;  %s303_s6 = int_to_ptr.vmem [resolvable:$true] %s302_s6 }
  0x29   :  { %v391_v11 = vpack.c.bf16 %v44_v10, %v43_v9  ;;  %v45_v12 = vld [vmem:[#allocation5 + $0x30] sm:$0xff]  ;;  %v46_v13 = vld [vmem:[#allocation5 + $0x38] sm:$0xff]  ;;  %v47_v15 = vld [vmem:[#allocation5 + $0x40] sm:$0xff]  ;;  %s467_s7 = scalar_lea.vmem %s303_s6, 128  ;;  %p472_p3 = scmp.lt.s32.totalorder %s303_s6, %s303_s6 }
  0x2a   :  { %386 = vmatpush3.bf16.msra.mxu0 %v385_v4  ;;  %389 = vmatpush3.bf16.msra.mxu1 %v388_v7  ;;  %v394_v14 = vpack.c.bf16 %v46_v13, %v45_v12  ;;  %v48_v16 = vld [vmem:[#allocation5 + $0x48] sm:$0xff]  ;;  %v49_v18 = vld [vmem:[#allocation5 + $0x50] sm:$0xff]  ;;  %v50_v19 = vld [vmem:[#allocation5 + $0x58] sm:$0xff]  ;;  %p468_p2 = scmp.ne.s32.totalorder %s303_s6, %s467_s7  ;;  %p473_p4 = scmp.lt.s32.totalorder %s467_s7, %s467_s7 }
  0x2b   :  { %399 = vmatprep.subr.bf16.mxu0 %v499_v0  ;;  %390 = vmatprep.subr.bf16.mxu1 %v499_v0  ;;  %v397_v17 = vpack.c.bf16 %v48_v16, %v47_v15  ;;  %v400_v20 = vpack.c.bf16 %v50_v19, %v49_v18  ;;  %v312_v21 = vld [vmem:[#allocation5 + $0x90] ss:$0 sm:$0xff]  ;;  %v51_v26 = vld [vmem:[#allocation5 + $0x60] sm:$0xff]  ;;  %v52_v27 = vld [vmem:[#allocation5 + $0x68] sm:$0xff] }
  0x2c   :  { %v403_v28 = vpack.c.bf16 %v52_v27, %v51_v26  ;;  %v53_v29 = vld [vmem:[#allocation5 + $0x70] sm:$0xff]  ;;  %v54_v30 = vld [vmem:[#allocation5 + $0x78] sm:$0xff]  ;;  %v55_v32 = vld [vmem:[#allocation5 + $0x80] sm:$0xff]  ;;  %p474_p5 = por %p473_p4, %p472_p3 }
  0x2d   :  { %344 = vmatmul.mubr.msk.f32.vlgmr.msra.gmra.mrb[0].mxu0 %vm64_vm1, %v38_v8  ;;  %v406_v31 = vpack.c.bf16 %v54_v30, %v53_v29  ;;  %v56_v33 = vld [vmem:[#allocation5 + $0x88] sm:$0xff]  ;;  %v314_v35 = vld [vmem:[#allocation5 + $0x91] ss:$0 sm:$0xff]  ;;  %v316_v40 = vld [vmem:[#allocation5 + $0x92] ss:$0 sm:$0xff] }
  0x2e   :  { %381 = vmatprep.mubr.msk.f32.mxu0 %vm500_vm0, %v501_v1  ;;  %392 = vmatpush3.bf16.msra.mxu1 %v391_v11  ;;  %v409_v34 = vpack.c.bf16 %v56_v33, %v55_v32  ;;  %p475_p6 = pnand %p474_p5, %p468_p2 }
  0x2f   :  { %393 = vmatprep.subr.bf16.mxu1 %v499_v0  ;;  %401 = vmatpush3.bf16.msra.mxu0 %v400_v20 }
  0x30   :  { %402 = vmatprep.subr.bf16.mxu0 %v499_v0 }
  0x32   :  { %395 = vmatpush3.bf16.msra.mxu1 %v394_v14 }
  0x33   :  { %396 = vmatprep.subr.bf16.mxu1 %v499_v0  ;;  %404 = vmatpush3.bf16.msra.mxu0 %v403_v28 }
  0x34   :  { %405 = vmatprep.subr.bf16.mxu0 %v499_v0 }
  0x36   :  { %398 = vmatpush3.bf16.msra.mxu1 %v397_v17 }
  0x37   :  { %407 = vmatpush3.bf16.msra.mxu0 %v406_v31 }
  0x38   :  { %408 = vmatprep.subr.bf16.mxu0 %v499_v0 }
  0x3b   :  { %410 = vmatpush3.bf16.msra.mxu0 %v409_v34 }
 0x100   :  { %v134_v22 = vpop.f32.mrb[0].mxu0 }
 0x101   :  { %v135_v23 = vadd.f32 %v312_v21, %v134_v22  ;;  %v345_v24 = vpop.f32.mrb[1].mxu0 }
 0x103   :  { %419 = vtanh.f32 %v135_v23 }
 0x10d   :  { %v420_v25 = vpop.eup %419 }
 0x10e   :  { %363 = vmatmul.mubr.msk.f32.vlgmr.msra.gmra.mrb[0].mxu1 %vm143_vm2, %v420_v25 }
 0x1e1   :  { %v213_v36 = vpop.f32.mrb[0].mxu1 }
 0x1e2   :  { %v214_v37 = vadd.f32 %v314_v35, %v213_v36  ;;  %v364_v38 = vpop.f32.mrb[1].mxu1 }
 0x1e4   :  { %421 = vtanh.f32 %v214_v37 }
 0x1ee   :  { %v422_v39 = vpop.eup %421 }
 0x1ef   :  { %382 = vmatmul.mubr.msk.f32.vlgmr.msra.gmra.mrb[2].mxu0 %vm143_vm2, %v422_v39 }
 0x2c2   :  { %v291_v41 = vpop.f32.mrb[2].mxu0 }
 0x2c3   :  { %v292_v42 = vadd.f32 %v316_v40, %v291_v41  ;;  %v383_v43 = vpop.f32.mrb[3].mxu0 }
 0x2c5   :  { %295 = vst [vmem:[#allocation7] sm:$0xff] %v292_v42 }
 0x2c6   :  { %478 = shalt.err (!%p475_p6)
}
 0x2c7   :  { %s479_s10 = scalar_lea.hbm %s568_s2, 128 }
 0x2c8   :  { %p480_p7 = scmp.ne.s32.totalorder %s568_s2, %s479_s10  ;;  %p483_p8 = scmp.lt.u32.totalorder %s479_s10, %s568_s2 }
 0x2ca   :  { %p485_p9 = pnand %p483_p8, %p480_p7 }
 0x2cc   :  { %488 = shalt.err (!%p485_p9)
}
 0x2cd   :  { %305 = dma.vmem_to_hbm [thread:$0]  %s303_s6, 128, %s568_s2, [#allocation4]  }
 0x2ce   :  { %493 = dma.done.wait [#allocation4], 128  }
 0x2cf   :  { %494 = vsyncadd [#allocation4], 4294967168 }
 0x2d0   :  { %309 = vsyncpa [#allocation3], 1 }
 0x2d1   :  { %310 = vsyncpa [#allocation6], 1 }
 0x2d2   :  { %311 = vsyncpa [#allocation4], 1 }

</bundles_post_ra>
